<compile_context>
chip_gen: v7x
topology: tpu7x:2x2x1
jax: 0.10.0
libtpu: 0.0.40
codegen_flags: <defaults>
</compile_context>

<pallas_src>
import jax
import jax.numpy as jnp
from jax import lax
from jax.experimental import pallas as pl
from jax.experimental.pallas import tpu as pltpu


def _round_up(n, m):
    return ((n + m - 1) // m) * m


def rnn_kernel(x_ref, wih_ref, whh_ref, b_ref, o_ref, xw_ref):
    # x_ref  : (S, B_pad, D_pad)   time-major padded input
    # wih_ref: (D_pad, H_pad)      pre-transposed, zero-padded W_ih
    # whh_ref: (H_pad, H_pad)      pre-transposed, zero-padded W_hh
    # b_ref  : (B_pad, H_pad)      b_ih + b_hh, pre-broadcast over batch
    # o_ref  : (B_pad, H_pad)      final hidden state
    # xw_ref : (S, B_pad, H_pad)   VMEM scratch: precomputed x@W_ih + bias
    seq_len, b_pad, d_pad = x_ref.shape
    h_pad = o_ref.shape[1]

    # --- one well-utilized GEMM for ALL timesteps, bias folded in -----------
    # (S, B_pad, D_pad) -> (S*B_pad, D_pad) merges leading dims only; since
    # B_pad % 8 == 0 and D_pad % 128 == 0 this is a layout no-op.
    x_all = x_ref[...].reshape(seq_len * b_pad, d_pad)
    xw = jnp.dot(x_all, wih_ref[...], preferred_element_type=jnp.float32)
    xw_ref[...] = xw.reshape(seq_len, b_pad, h_pad) + b_ref[...][None, :, :]

    # Only W_hh stays live in vregs across the serial recurrence (16 vregs).
    w_hh = whh_ref[...]

    h0 = jnp.zeros(o_ref.shape, jnp.float32)

    def step(t, h):
        # Per-step critical path: one MXU op + one VPU add + EUP tanh.
        pre = jnp.dot(h, w_hh, preferred_element_type=jnp.float32) + xw_ref[t]
        return jnp.tanh(pre)

    # Full unroll for short sequences; bounded unroll to cap code size / live
    # ranges when S grows.
    unroll = seq_len if seq_len <= 16 else 8
    h = lax.fori_loop(0, seq_len, step, h0, unroll=unroll)
    o_ref[...] = h.astype(o_ref.dtype)


def rnn_pallas(x, w_ih, b_ih, w_hh, b_hh, output_size):
    """x: (B, S, D).  Returns (B, output_size) = h_S[:, -output_size:]."""
    B, S, D = x.shape
    H = w_ih.shape[0]
    assert w_ih.shape == (H, D)
    assert w_hh.shape == (H, H)
    assert output_size <= H

    B_pad = _round_up(B, 8)
    D_pad = _round_up(D, 128)
    H_pad = _round_up(H, 128)

    # --- wrapper-side layout plumbing (zero FLOPs) ---------------------------
    # Time-major so the kernel slices xw_ref[t] along the leading axis.
    # TODO(synk): for long S, fetch tiles straight from the natural (B,S,D)
    # layout via a BlockSpec index_map instead of materializing a padded copy.
    x_tm = jnp.transpose(x, (1, 0, 2)).astype(jnp.float32)  # (S, B, D)
    x_pad = jnp.zeros((S, B_pad, D_pad), jnp.float32).at[:, :B, :D].set(x_tm)

    # Pre-transpose weights -> (in, out); zero-pad to lane-dense tiles.
    wih_pad = jnp.zeros((D_pad, H_pad), jnp.float32).at[:D, :H].set(w_ih.T)
    whh_pad = jnp.zeros((H_pad, H_pad), jnp.float32).at[:H, :H].set(w_hh.T)

    # Fold both biases together, pre-broadcast over the padded batch.
    b_comb = (b_ih + b_hh).astype(jnp.float32)  # (H,)
    b_pad = jnp.zeros((B_pad, H_pad), jnp.float32).at[:, :H].set(
        jnp.broadcast_to(b_comb[None, :], (B_pad, H))
    )

    flops = 2 * S * B_pad * D_pad * H_pad + 2 * S * B_pad * H_pad * H_pad
    bytes_accessed = 4 * (
        x_pad.size + wih_pad.size + whh_pad.size + b_pad.size + B_pad * H_pad
    )

    h_pad = pl.pallas_call(
        rnn_kernel,
        out_shape=jax.ShapeDtypeStruct((B_pad, H_pad), jnp.float32),
        in_specs=[
            pl.BlockSpec(memory_space=pltpu.MemorySpace.VMEM),
            pl.BlockSpec(memory_space=pltpu.MemorySpace.VMEM),
            pl.BlockSpec(memory_space=pltpu.MemorySpace.VMEM),
            pl.BlockSpec(memory_space=pltpu.MemorySpace.VMEM),
        ],
        out_specs=pl.BlockSpec(memory_space=pltpu.MemorySpace.VMEM),
        scratch_shapes=[pltpu.VMEM((S, B_pad, H_pad), jnp.float32)],
        cost_estimate=pl.CostEstimate(
            flops=flops,
            transcendentals=S * B_pad * H_pad,
            bytes_accessed=bytes_accessed,
        ),
    )(x_pad, wih_pad, whh_pad, b_pad)

    h = h_pad[:B, :H]
    return h[:, H - output_size:]


def rnn_reference(x, w_ih, b_ih, w_hh, b_hh, output_size):
    """Pure-JAX reference mirroring the PyTorch forward exactly."""
    B, S, D = x.shape
    H = w_ih.shape[0]
    h = jnp.zeros((B, H), jnp.float32)
    for t in range(S):
        h = jnp.tanh((x[:, t] @ w_ih.T + b_ih) + (h @ w_hh.T + b_hh))
    return h[:, H - output_size:]


if __name__ == "__main__":
    # Small shapes consistent with the module's forward pass.
    batch = 2
    seq_len = 8
    input_size = 4
    hidden_size = 32
    output_size = 16

    key = jax.random.PRNGKey(0)
    kx, k1, k2, k3, k4 = jax.random.split(key, 5)

    bound_ih = input_size ** -0.5
    bound_hh = hidden_size ** -0.5
    x = jax.random.uniform(kx, (batch, seq_len, input_size), jnp.float32)
    w_ih = jax.random.uniform(
        k1, (hidden_size, input_size), jnp.float32, -bound_ih, bound_ih
    )
    b_ih = jax.random.uniform(
        k2, (hidden_size,), jnp.float32, -bound_ih, bound_ih
    )
    w_hh = jax.random.uniform(
        k3, (hidden_size, hidden_size), jnp.float32, -bound_hh, bound_hh
    )
    b_hh = jax.random.uniform(
        k4, (hidden_size,), jnp.float32, -bound_hh, bound_hh
    )

    out = rnn_pallas(x, w_ih, b_ih, w_hh, b_hh, output_size)
    out = jax.block_until_ready(out)

    ref = rnn_reference(x, w_ih, b_ih, w_hh, b_hh, output_size)
    assert out.shape == (batch, output_size)
    assert jnp.allclose(out, ref, atol=1e-5, rtol=1e-5), float(
        jnp.max(jnp.abs(out - ref))
    )

    print("KERNEL_OK")
</pallas_src>

<mosaic_0001>
module attributes {stable_mosaic.version = 11 : i64} {
  func.func @rnn_kernel(%arg0: memref<8x8x128xf32, #tpu.memory_space<vmem>>, %arg1: memref<128x128xf32, #tpu.memory_space<vmem>>, %arg2: memref<128x128xf32, #tpu.memory_space<vmem>>, %arg3: memref<8x128xf32, #tpu.memory_space<vmem>>, %arg4: memref<8x128xf32, #tpu.memory_space<vmem>>, %arg5: memref<8x8x128xf32, #tpu.memory_space<vmem>>) attributes {dimension_semantics = [], scalar_prefetch = 0 : i64, scratch_operands = 1 : i64, tpu.core_type = #tpu.core_type<tc>} {
    %c0 = arith.constant 0 : index
    %c0_0 = arith.constant 0 : index
    %c0_1 = arith.constant 0 : index
    %0 = vector.load %arg0[%c0, %c0_0, %c0_1] : memref<8x8x128xf32, #tpu.memory_space<vmem>>, vector<8x8x128xf32>
    %1 = vector.shape_cast %0 : vector<8x8x128xf32> to vector<64x128xf32>
    %c0_2 = arith.constant 0 : index
    %c0_3 = arith.constant 0 : index
    %2 = vector.load %arg1[%c0_2, %c0_3] : memref<128x128xf32, #tpu.memory_space<vmem>>, vector<128x128xf32>
    %cst = arith.constant dense<0.000000e+00> : vector<64x128xf32>
    %3 = tpu.matmul %1, %2, %cst {dimension_numbers = #tpu.dot_dimension_numbers<[1], [0], [0], [1], [0, 0, 1, 1], [], []>} : vector<64x128xf32>, vector<128x128xf32>, vector<64x128xf32> -> vector<64x128xf32>
    %4 = vector.shape_cast %3 : vector<64x128xf32> to vector<8x8x128xf32>
    %c0_4 = arith.constant 0 : index
    %c0_5 = arith.constant 0 : index
    %5 = vector.load %arg3[%c0_4, %c0_5] : memref<8x128xf32, #tpu.memory_space<vmem>>, vector<8x128xf32>
    %6 = vector.shape_cast %5 : vector<8x128xf32> to vector<1x8x128xf32>
    %7 = vector.broadcast %6 : vector<1x8x128xf32> to vector<8x8x128xf32>
    %8 = arith.addf %4, %7 : vector<8x8x128xf32>
    %c0_6 = arith.constant 0 : index
    %c0_7 = arith.constant 0 : index
    %c0_8 = arith.constant 0 : index
    %9 = vector.load %arg5[%c0_6, %c0_7, %c0_8] : memref<8x8x128xf32, #tpu.memory_space<vmem>>, vector<8x8x128xf32>
    tpu.vector_store %arg5[%c0_6, %c0_7, %c0_8], %8 {strides = array<i32>} : memref<8x8x128xf32, #tpu.memory_space<vmem>>, vector<8x8x128xf32>,
    %c0_9 = arith.constant 0 : index
    %c0_10 = arith.constant 0 : index
    %10 = vector.load %arg2[%c0_9, %c0_10] : memref<128x128xf32, #tpu.memory_space<vmem>>, vector<128x128xf32>
    %cst_11 = arith.constant 0.000000e+00 : f32
    %11 = vector.broadcast %cst_11 : f32 to vector<8x128xf32>
    %c0_i32 = arith.constant 0 : i32
    %cst_12 = arith.constant dense<0.000000e+00> : vector<8x128xf32>
    %12 = tpu.matmul %11, %10, %cst_12 {dimension_numbers = #tpu.dot_dimension_numbers<[1], [0], [0], [1], [0, 0, 1, 1], [], []>} : vector<8x128xf32>, vector<128x128xf32>, vector<8x128xf32> -> vector<8x128xf32>
    %13 = arith.index_cast %c0_i32 : i32 to index
    %c0_13 = arith.constant 0 : index
    %c0_14 = arith.constant 0 : index
    %14 = vector.load %arg5[%13, %c0_13, %c0_14] : memref<8x8x128xf32, #tpu.memory_space<vmem>>, vector<1x8x128xf32>
    %15 = vector.shape_cast %14 : vector<1x8x128xf32> to vector<8x128xf32>
    %16 = arith.addf %12, %15 : vector<8x128xf32>
    %17 = math.tanh %16 : vector<8x128xf32>
    %c1_i32 = arith.constant 1 : i32
    %cst_15 = arith.constant dense<0.000000e+00> : vector<8x128xf32>
    %18 = tpu.matmul %17, %10, %cst_15 {dimension_numbers = #tpu.dot_dimension_numbers<[1], [0], [0], [1], [0, 0, 1, 1], [], []>} : vector<8x128xf32>, vector<128x128xf32>, vector<8x128xf32> -> vector<8x128xf32>
    %19 = arith.index_cast %c1_i32 : i32 to index
    %c0_16 = arith.constant 0 : index
    %c0_17 = arith.constant 0 : index
    %20 = vector.load %arg5[%19, %c0_16, %c0_17] : memref<8x8x128xf32, #tpu.memory_space<vmem>>, vector<1x8x128xf32>
    %21 = vector.shape_cast %20 : vector<1x8x128xf32> to vector<8x128xf32>
    %22 = arith.addf %18, %21 : vector<8x128xf32>
    %23 = math.tanh %22 : vector<8x128xf32>
    %c2_i32 = arith.constant 2 : i32
    %cst_18 = arith.constant dense<0.000000e+00> : vector<8x128xf32>
    %24 = tpu.matmul %23, %10, %cst_18 {dimension_numbers = #tpu.dot_dimension_numbers<[1], [0], [0], [1], [0, 0, 1, 1], [], []>} : vector<8x128xf32>, vector<128x128xf32>, vector<8x128xf32> -> vector<8x128xf32>
    %25 = arith.index_cast %c2_i32 : i32 to index
    %c0_19 = arith.constant 0 : index
    %c0_20 = arith.constant 0 : index
    %26 = vector.load %arg5[%25, %c0_19, %c0_20] : memref<8x8x128xf32, #tpu.memory_space<vmem>>, vector<1x8x128xf32>
    %27 = vector.shape_cast %26 : vector<1x8x128xf32> to vector<8x128xf32>
    %28 = arith.addf %24, %27 : vector<8x128xf32>
    %29 = math.tanh %28 : vector<8x128xf32>
    %c3_i32 = arith.constant 3 : i32
    %cst_21 = arith.constant dense<0.000000e+00> : vector<8x128xf32>
    %30 = tpu.matmul %29, %10, %cst_21 {dimension_numbers = #tpu.dot_dimension_numbers<[1], [0], [0], [1], [0, 0, 1, 1], [], []>} : vector<8x128xf32>, vector<128x128xf32>, vector<8x128xf32> -> vector<8x128xf32>
    %31 = arith.index_cast %c3_i32 : i32 to index
    %c0_22 = arith.constant 0 : index
    %c0_23 = arith.constant 0 : index
    %32 = vector.load %arg5[%31, %c0_22, %c0_23] : memref<8x8x128xf32, #tpu.memory_space<vmem>>, vector<1x8x128xf32>
    %33 = vector.shape_cast %32 : vector<1x8x128xf32> to vector<8x128xf32>
    %34 = arith.addf %30, %33 : vector<8x128xf32>
    %35 = math.tanh %34 : vector<8x128xf32>
    %c4_i32 = arith.constant 4 : i32
    %cst_24 = arith.constant dense<0.000000e+00> : vector<8x128xf32>
    %36 = tpu.matmul %35, %10, %cst_24 {dimension_numbers = #tpu.dot_dimension_numbers<[1], [0], [0], [1], [0, 0, 1, 1], [], []>} : vector<8x128xf32>, vector<128x128xf32>, vector<8x128xf32> -> vector<8x128xf32>
    %37 = arith.index_cast %c4_i32 : i32 to index
    %c0_25 = arith.constant 0 : index
    %c0_26 = arith.constant 0 : index
    %38 = vector.load %arg5[%37, %c0_25, %c0_26] : memref<8x8x128xf32, #tpu.memory_space<vmem>>, vector<1x8x128xf32>
    %39 = vector.shape_cast %38 : vector<1x8x128xf32> to vector<8x128xf32>
    %40 = arith.addf %36, %39 : vector<8x128xf32>
    %41 = math.tanh %40 : vector<8x128xf32>
    %c5_i32 = arith.constant 5 : i32
    %cst_27 = arith.constant dense<0.000000e+00> : vector<8x128xf32>
    %42 = tpu.matmul %41, %10, %cst_27 {dimension_numbers = #tpu.dot_dimension_numbers<[1], [0], [0], [1], [0, 0, 1, 1], [], []>} : vector<8x128xf32>, vector<128x128xf32>, vector<8x128xf32> -> vector<8x128xf32>
    %43 = arith.index_cast %c5_i32 : i32 to index
    %c0_28 = arith.constant 0 : index
    %c0_29 = arith.constant 0 : index
    %44 = vector.load %arg5[%43, %c0_28, %c0_29] : memref<8x8x128xf32, #tpu.memory_space<vmem>>, vector<1x8x128xf32>
    %45 = vector.shape_cast %44 : vector<1x8x128xf32> to vector<8x128xf32>
    %46 = arith.addf %42, %45 : vector<8x128xf32>
    %47 = math.tanh %46 : vector<8x128xf32>
    %c6_i32 = arith.constant 6 : i32
    %cst_30 = arith.constant dense<0.000000e+00> : vector<8x128xf32>
    %48 = tpu.matmul %47, %10, %cst_30 {dimension_numbers = #tpu.dot_dimension_numbers<[1], [0], [0], [1], [0, 0, 1, 1], [], []>} : vector<8x128xf32>, vector<128x128xf32>, vector<8x128xf32> -> vector<8x128xf32>
    %49 = arith.index_cast %c6_i32 : i32 to index
    %c0_31 = arith.constant 0 : index
    %c0_32 = arith.constant 0 : index
    %50 = vector.load %arg5[%49, %c0_31, %c0_32] : memref<8x8x128xf32, #tpu.memory_space<vmem>>, vector<1x8x128xf32>
    %51 = vector.shape_cast %50 : vector<1x8x128xf32> to vector<8x128xf32>
    %52 = arith.addf %48, %51 : vector<8x128xf32>
    %53 = math.tanh %52 : vector<8x128xf32>
    %c7_i32 = arith.constant 7 : i32
    %cst_33 = arith.constant dense<0.000000e+00> : vector<8x128xf32>
    %54 = tpu.matmul %53, %10, %cst_33 {dimension_numbers = #tpu.dot_dimension_numbers<[1], [0], [0], [1], [0, 0, 1, 1], [], []>} : vector<8x128xf32>, vector<128x128xf32>, vector<8x128xf32> -> vector<8x128xf32>
    %55 = arith.index_cast %c7_i32 : i32 to index
    %c0_34 = arith.constant 0 : index
    %c0_35 = arith.constant 0 : index
    %56 = vector.load %arg5[%55, %c0_34, %c0_35] : memref<8x8x128xf32, #tpu.memory_space<vmem>>, vector<1x8x128xf32>
    %57 = vector.shape_cast %56 : vector<1x8x128xf32> to vector<8x128xf32>
    %58 = arith.addf %54, %57 : vector<8x128xf32>
    %59 = math.tanh %58 : vector<8x128xf32>
    %c8_i32 = arith.constant 8 : i32
    %c0_36 = arith.constant 0 : index
    %c0_37 = arith.constant 0 : index
    %60 = vector.load %arg4[%c0_36, %c0_37] : memref<8x128xf32, #tpu.memory_space<vmem>>, vector<8x128xf32>
    tpu.vector_store %arg4[%c0_36, %c0_37], %59 {strides = array<i32>} : memref<8x128xf32, #tpu.memory_space<vmem>>, vector<8x128xf32>,
    return
  }
}

</mosaic_0001>

<bundles_post_ra>
// kernel: tpu_custom_call.1
= control target key start
LH: loop header
LB: loop body
LE: loop exit
PB: predicated region body
PF: predicated region fallthrough
CT: control target
= control target key end

     0   :  { %9 = vsyncpa [#allocation4], 0  ;;  %s1932_s0 = inlined_call_operand.hbm [shape: f32[8,8,128], index: 0, kind: input, shape index: {}]   ;;  %s1933_s1 = inlined_call_operand.hbm [shape: f32[128,128], index: 1, kind: input, shape index: {}]   ;;  %s1934_s2 = inlined_call_operand.hbm [shape: f32[128,128], index: 2, kind: input, shape index: {}]   ;;  %s1935_s3 = inlined_call_operand.vmem [shape: f32[8,128], index: 3, kind: input, shape index: {}]   ;;  %s1936_s4 = inlined_call_operand.hbm [shape: f32[8,128], index: 4, kind: output, shape index: {}]  }
   0x1   :  { %10 = vsyncpa [#allocation7], 0 }
   0x2   :  { %11 = vsyncpa [#allocation5], 0  ;;  %s1648_s15 = smov [#allocation6]   ;;  %s1649_s17 = smov [#allocation3]  }
   0x3   :  { %s29_s16 = sshll.u32 %s1648_s15, 4  ;;  %s17_s18 = sshll.u32 %s1649_s17, 4  ;;  %s30_s16 = int_to_ptr.vmem [resolvable:$true] %s29_s16  ;;  %s1682_s18 = int_to_ptr.vmem [resolvable:$true] %s17_s18 }
   0x4   :  { %s1554_s21 = scalar_lea.hbm %s1933_s1, 2048 }
   0x5   :  { %p1555_p0 = scmp.ne.s32.totalorder %s1933_s1, %s1554_s21  ;;  %p1558_p1 = scmp.lt.u32.totalorder %s1554_s21, %s1933_s1 }
   0x7   :  { %p1560_p2 = pnand %p1558_p1, %p1555_p0 }
   0x9   :  { %1563 = shalt.err (!%p1560_p2)
}
   0xa   :  { %s1564_s26 = scalar_lea.vmem %s30_s16, 2048  ;;  %p1569_p4 = scmp.lt.s32.totalorder %s30_s16, %s30_s16 }
   0xb   :  { %p1565_p3 = scmp.ne.s32.totalorder %s30_s16, %s1564_s26  ;;  %p1570_p5 = scmp.lt.s32.totalorder %s1564_s26, %s1564_s26 }
   0xd   :  { %p1571_p6 = por %p1570_p5, %p1569_p4 }
   0xf   :  { %p1572_p7 = pnand %p1571_p6, %p1565_p3 }
  0x11   :  { %1575 = shalt.err (!%p1572_p7)
}
  0x12   :  { %s1650_s27 = smov 128   ;;  %s1651_s28 = smov 8  }
  0x13   :  { %35 = dma.hbm_to_vmem [thread:$0]  %s1933_s1, 2048, %s30_s16, [#allocation7], %s1650_s27, %s1650_s27, %s1651_s28  }
  0x14   :  { %s1576_s7 = scalar_lea.hbm %s1932_s0, 1024 }
  0x15   :  { %p1577_p8 = scmp.ne.s32.totalorder %s1932_s0, %s1576_s7  ;;  %p1580_p9 = scmp.lt.u32.totalorder %s1576_s7, %s1932_s0 }
  0x17   :  { %p1582_p10 = pnand %p1580_p9, %p1577_p8 }
  0x19   :  { %1585 = shalt.err (!%p1582_p10)
}
  0x1a   :  { %s1586_s12 = scalar_lea.vmem %s1682_s18, 1024  ;;  %p1591_p12 = scmp.lt.s32.totalorder %s1682_s18, %s1682_s18 }
  0x1b   :  { %p1587_p11 = scmp.ne.s32.totalorder %s1682_s18, %s1586_s12  ;;  %p1592_p13 = scmp.lt.s32.totalorder %s1586_s12, %s1586_s12 }
  0x1d   :  { %p1593_p0 = por %p1592_p13, %p1591_p12 }
  0x1f   :  { %p1594_p1 = pnand %p1593_p0, %p1587_p11 }
  0x21   :  { %1597 = shalt.err (!%p1594_p1)
}
  0x22   :  { %23 = dma.hbm_to_vmem [thread:$0]  %s1932_s0, 1024, %s1682_s18, [#allocation4], %s1650_s27, %s1650_s27, %s1651_s28  }
  0x23   :  { %s1652_s14 = smov [#allocation8]   ;;  %s1598_s19 = scalar_lea.hbm %s1934_s2, 2048 }
  0x24   :  { %s41_s15 = sshll.u32 %s1652_s14, 4  ;;  %p1599_p2 = scmp.ne.s32.totalorder %s1934_s2, %s1598_s19  ;;  %s42_s15 = int_to_ptr.vmem [resolvable:$true] %s41_s15 }
  0x25   :  { %p1602_p3 = scmp.lt.u32.totalorder %s1598_s19, %s1934_s2 }
  0x27   :  { %p1604_p4 = pnand %p1602_p3, %p1599_p2 }
  0x29   :  { %1607 = shalt.err (!%p1604_p4)
}
  0x2a   :  { %s1608_s24 = scalar_lea.vmem %s42_s15, 2048  ;;  %p1613_p6 = scmp.lt.s32.totalorder %s42_s15, %s42_s15 }
  0x2b   :  { %p1609_p5 = scmp.ne.s32.totalorder %s42_s15, %s1608_s24  ;;  %p1614_p7 = scmp.lt.s32.totalorder %s1608_s24, %s1608_s24 }
  0x2d   :  { %p1615_p8 = por %p1614_p7, %p1613_p6 }
  0x2f   :  { %p1616_p9 = pnand %p1615_p8, %p1609_p5 }
  0x31   :  { %1619 = shalt.err (!%p1616_p9)
}
  0x32   :  { %47 = dma.hbm_to_vmem [thread:$0]  %s1934_s2, 2048, %s42_s15, [#allocation7], %s1650_s27, %s1650_s27, %s1651_s28  }
  0x33   :  { %1642 = dma.done.wait [#allocation4], 1024  }
  0x34   :  { %1643 = vsyncadd [#allocation4], 4294966272 }
  0x35   :  { %1644 = dma.done.wait [#allocation7], 4096  }
  0x36   :  { %1645 = vsyncadd [#allocation7], 4294963200  ;;  %v1653_v0 = vmov 0.0|0.0   ;;  %vm1654_vm0 = vmmov 0   ;;  %v1655_v1 = vmov 0.0   ;;  %v67_v2 = vld [vmem:[#allocation6] sm:$0xff] }
  0x37   :  { %1337 = vmatprep.subr.bf16.mxu1 %v1653_v0  ;;  %1057 = vmatprep.mubr.msk.f32.mxu1 %vm1654_vm0, %v1655_v1  ;;  %v68_v3 = vld [vmem:[#allocation6 + $0x8] sm:$0xff]  ;;  %v205_v4 = vld [vmem:[#allocation8] sm:$0xff]  ;;  %v69_v7 = vld [vmem:[#allocation6 + $0x10] sm:$0xff] }
  0x38   :  { %v1305_v5 = vpack.c.bf16 %v68_v3, %v67_v2  ;;  %v206_v6 = vld [vmem:[#allocation8 + $0x8] sm:$0xff]  ;;  %v70_v8 = vld [vmem:[#allocation6 + $0x18] sm:$0xff]  ;;  %v207_v11 = vld [vmem:[#allocation8 + $0x10] sm:$0xff] }
  0x39   :  { %v1737_v9 = vpack.c.bf16 %v206_v6, %v205_v4  ;;  %v1309_v10 = vpack.c.bf16 %v70_v8, %v69_v7  ;;  %v208_v12 = vld [vmem:[#allocation8 + $0x18] sm:$0xff]  ;;  %v71_v13 = vld [vmem:[#allocation6 + $0x20] sm:$0xff]  ;;  %v72_v14 = vld [vmem:[#allocation6 + $0x28] sm:$0xff] }
  0x3a   :  { %1306 = vmatprep.subr.bf16.mxu0 %v1305_v5  ;;  %v1740_v15 = vpack.c.bf16 %v208_v12, %v207_v11  ;;  %v1313_v16 = vpack.c.bf16 %v72_v14, %v71_v13  ;;  %v209_v17 = vld [vmem:[#allocation8 + $0x20] sm:$0xff]  ;;  %v210_v18 = vld [vmem:[#allocation8 + $0x28] sm:$0xff]  ;;  %v73_v19 = vld [vmem:[#allocation6 + $0x30] sm:$0xff] }
  0x3b   :  { %1308 = vmatpush3.bf16.msra.mxu0 %v1305_v5  ;;  %1339 = vmatpush3.bf16.msra.mxu1 %v1737_v9  ;;  %v74_v20 = vld [vmem:[#allocation6 + $0x38] sm:$0xff]  ;;  %v1744_v21 = vpack.c.bf16 %v210_v18, %v209_v17  ;;  %v211_v23 = vld [vmem:[#allocation8 + $0x30] sm:$0xff]  ;;  %v75_v25 = vld [vmem:[#allocation6 + $0x40] sm:$0xff] }
  0x3c   :  { %1310 = vmatprep.subr.bf16.mxu0 %v1309_v10  ;;  %1340 = vmatprep.subr.bf16.mxu1 %v1653_v0  ;;  %v1317_v22 = vpack.c.bf16 %v74_v20, %v73_v19  ;;  %v212_v24 = vld [vmem:[#allocation8 + $0x38] sm:$0xff]  ;;  %v76_v26 = vld [vmem:[#allocation6 + $0x48] sm:$0xff]  ;;  %v59_v27 = vld [vmem:[#allocation3] sm:$0xff] }
  0x3d   :  { %1013 = vmatprep.mubr.f32.mxu0 %v59_v27  ;;  %v1748_v28 = vpack.c.bf16 %v212_v24, %v211_v23  ;;  %v1321_v29 = vpack.c.bf16 %v76_v26, %v75_v25  ;;  %v213_v30 = vld [vmem:[#allocation8 + $0x40] sm:$0xff]  ;;  %v214_v31 = vld [vmem:[#allocation8 + $0x48] sm:$0xff]  ;;  %v77_v32 = vld [vmem:[#allocation6 + $0x50] sm:$0xff] }
  0x3e   :  { %v78_v33 = vld [vmem:[#allocation6 + $0x58] sm:$0xff]  ;;  %v1752_v34 = vpack.c.bf16 %v214_v31, %v213_v30  ;;  %v215_v36 = vld [vmem:[#allocation8 + $0x50] sm:$0xff]  ;;  %v79_v38 = vld [vmem:[#allocation6 + $0x60] sm:$0xff] }
  0x3f   :  { %1312 = vmatpush3.bf16.msra.mxu0 %v1309_v10  ;;  %1342 = vmatpush3.bf16.msra.mxu1 %v1740_v15  ;;  %v1325_v35 = vpack.c.bf16 %v78_v33, %v77_v32  ;;  %v216_v37 = vld [vmem:[#allocation8 + $0x58] sm:$0xff]  ;;  %v80_v39 = vld [vmem:[#allocation6 + $0x68] sm:$0xff]  ;;  %v217_v42 = vld [vmem:[#allocation8 + $0x60] sm:$0xff] }
  0x40   :  { %1314 = vmatprep.subr.bf16.mxu0 %v1313_v16  ;;  %1343 = vmatprep.subr.bf16.mxu1 %v1653_v0  ;;  %v1756_v40 = vpack.c.bf16 %v216_v37, %v215_v36  ;;  %v1329_v41 = vpack.c.bf16 %v80_v39, %v79_v38  ;;  %v218_v43 = vld [vmem:[#allocation8 + $0x68] sm:$0xff]  ;;  %v81_v44 = vld [vmem:[#allocation6 + $0x70] sm:$0xff]  ;;  %v82_v45 = vld [vmem:[#allocation6 + $0x78] sm:$0xff] }
  0x41   :  { %v1760_v46 = vpack.c.bf16 %v218_v43, %v217_v42  ;;  %v1333_v47 = vpack.c.bf16 %v82_v45, %v81_v44  ;;  %v219_v48 = vld [vmem:[#allocation8 + $0x70] sm:$0xff]  ;;  %v220_v49 = vld [vmem:[#allocation8 + $0x78] sm:$0xff]  ;;  %v60_v51 = vld [vmem:[#allocation3 + $0x8] sm:$0xff] }
  0x42   :  { %v1764_v50 = vpack.c.bf16 %v220_v49, %v219_v48  ;;  %v61_v52 = vld [vmem:[#allocation3 + $0x10] sm:$0xff]  ;;  %v62_v53 = vld [vmem:[#allocation3 + $0x18] sm:$0xff]  ;;  %v63_v54 = vld [vmem:[#allocation3 + $0x20] sm:$0xff] }
  0x43   :  { %1316 = vmatpush3.bf16.msra.mxu0 %v1313_v16  ;;  %1345 = vmatpush3.bf16.msra.mxu1 %v1744_v21  ;;  %v64_v55 = vld [vmem:[#allocation3 + $0x28] sm:$0xff]  ;;  %v65_v56 = vld [vmem:[#allocation3 + $0x30] sm:$0xff]  ;;  %v66_v57 = vld [vmem:[#allocation3 + $0x38] sm:$0xff] }
  0x44   :  { %1318 = vmatprep.subr.bf16.mxu0 %v1317_v22  ;;  %1346 = vmatprep.subr.bf16.mxu1 %v1653_v0  ;;  %v1810_v58 = vld [vmem:[%s1935_s3] sm:$0xff]  ;;  %s1656_s3 = smov [#allocation9]  }
  0x45   :  { %s811_s26 = sshll.u32 %s1656_s3, 4  ;;  %s812_s26 = int_to_ptr.vmem [resolvable:$true] %s811_s26 }
  0x46   :  { %s1620_s27 = scalar_lea.vmem %s812_s26, 128  ;;  %p1625_p11 = scmp.lt.s32.totalorder %s812_s26, %s812_s26 }
  0x47   :  { %1320 = vmatpush3.bf16.msra.mxu0 %v1317_v22  ;;  %1348 = vmatpush3.bf16.msra.mxu1 %v1748_v28  ;;  %p1621_p10 = scmp.ne.s32.totalorder %s812_s26, %s1620_s27  ;;  %p1626_p12 = scmp.lt.s32.totalorder %s1620_s27, %s1620_s27 }
  0x48   :  { %1322 = vmatprep.subr.bf16.mxu0 %v1321_v29  ;;  %1349 = vmatprep.subr.bf16.mxu1 %v1653_v0 }
  0x49   :  { %p1627_p13 = por %p1626_p12, %p1625_p11 }
  0x4b   :  { %1324 = vmatpush3.bf16.msra.mxu0 %v1321_v29  ;;  %1351 = vmatpush3.bf16.msra.mxu1 %v1752_v34  ;;  %p1628_p0 = pnand %p1627_p13, %p1621_p10 }
  0x4c   :  { %1326 = vmatprep.subr.bf16.mxu0 %v1325_v35  ;;  %1352 = vmatprep.subr.bf16.mxu1 %v1653_v0 }
  0x4f   :  { %1328 = vmatpush3.bf16.msra.mxu0 %v1325_v35  ;;  %1354 = vmatpush3.bf16.msra.mxu1 %v1756_v40 }
  0x50   :  { %1330 = vmatprep.subr.bf16.mxu0 %v1329_v41  ;;  %1355 = vmatprep.subr.bf16.mxu1 %v1653_v0 }
  0x53   :  { %1332 = vmatpush3.bf16.msra.mxu0 %v1329_v41  ;;  %1357 = vmatpush3.bf16.msra.mxu1 %v1760_v46 }
  0x54   :  { %1334 = vmatprep.subr.bf16.mxu0 %v1333_v47  ;;  %1358 = vmatprep.subr.bf16.mxu1 %v1653_v0 }
  0x57   :  { %1336 = vmatpush3.bf16.msra.mxu0 %v1333_v47  ;;  %1360 = vmatpush3.bf16.msra.mxu1 %v1764_v50 }
  0x58   :  { %1361 = vmatprep.subr.bf16.mxu0 %v1653_v0  ;;  %1385 = vmatprep.subr.bf16.mxu1 %v1653_v0 }
  0x5a   :  { %1014 = vmatmul.mubr.f32.vlgmr.msra.gmra.mrb[0].mxu0 %v60_v51  ;;  %1058 = vmatmul.mubr.f32.vlgmr.msra.gmra.mrb[0].mxu1 %v1655_v1 }
  0x5b   :  { %1363 = vmatpush3.bf16.msra.mxu0 %v1737_v9  ;;  %1387 = vmatpush3.bf16.msra.mxu1 %v1737_v9 }
  0x5c   :  { %1364 = vmatprep.subr.bf16.mxu0 %v1653_v0  ;;  %1388 = vmatprep.subr.bf16.mxu1 %v1653_v0 }
  0x5d   :  { %1127 = vmatprep.mubr.msk.f32.mxu1 %vm1654_vm0, %v1655_v1  ;;  %1016 = vmatprep.mubr.f32.mxu0 %v61_v52 }
  0x5e   :  { %1017 = vmatmul.mubr.f32.gmra.mrb[2].mxu0 %v62_v53 }
  0x5f   :  { %1366 = vmatpush3.bf16.msra.mxu0 %v1740_v15  ;;  %1390 = vmatpush3.bf16.msra.mxu1 %v1740_v15 }
  0x60   :  { %1367 = vmatprep.subr.bf16.mxu0 %v1653_v0  ;;  %1391 = vmatprep.subr.bf16.mxu1 %v1653_v0 }
  0x61   :  { %1019 = vmatprep.mubr.f32.mxu0 %v63_v54 }
  0x62   :  { %1020 = vmatmul.mubr.f32.gmra.mrb[4].mxu0 %v64_v55 }
  0x63   :  { %1369 = vmatpush3.bf16.msra.mxu0 %v1744_v21  ;;  %1393 = vmatpush3.bf16.msra.mxu1 %v1744_v21 }
  0x64   :  { %1370 = vmatprep.subr.bf16.mxu0 %v1653_v0  ;;  %1394 = vmatprep.subr.bf16.mxu1 %v1653_v0 }
  0x65   :  { %1022 = vmatprep.mubr.f32.mxu0 %v65_v56 }
  0x66   :  { %1023 = vmatmul.mubr.f32.gmra.mrb[6].mxu0 %v66_v57 }
  0x67   :  { %1372 = vmatpush3.bf16.msra.mxu0 %v1748_v28  ;;  %1396 = vmatpush3.bf16.msra.mxu1 %v1748_v28 }
  0x68   :  { %1373 = vmatprep.subr.bf16.mxu0 %v1653_v0  ;;  %1397 = vmatprep.subr.bf16.mxu1 %v1653_v0 }
  0x69   :  { %1092 = vmatprep.mubr.msk.f32.mxu0 %vm1654_vm0, %v1655_v1 }
  0x6b   :  { %1375 = vmatpush3.bf16.msra.mxu0 %v1752_v34  ;;  %1399 = vmatpush3.bf16.msra.mxu1 %v1752_v34 }
  0x6c   :  { %1376 = vmatprep.subr.bf16.mxu0 %v1653_v0  ;;  %1400 = vmatprep.subr.bf16.mxu1 %v1653_v0 }
  0x6f   :  { %1378 = vmatpush3.bf16.msra.mxu0 %v1756_v40  ;;  %1402 = vmatpush3.bf16.msra.mxu1 %v1756_v40 }
  0x70   :  { %1379 = vmatprep.subr.bf16.mxu0 %v1653_v0  ;;  %1403 = vmatprep.subr.bf16.mxu1 %v1653_v0 }
  0x73   :  { %1381 = vmatpush3.bf16.msra.mxu0 %v1760_v46  ;;  %1405 = vmatpush3.bf16.msra.mxu1 %v1760_v46 }
  0x74   :  { %1382 = vmatprep.subr.bf16.mxu0 %v1653_v0  ;;  %1406 = vmatprep.subr.bf16.mxu1 %v1653_v0 }
  0x77   :  { %1384 = vmatpush3.bf16.msra.mxu0 %v1764_v50  ;;  %1408 = vmatpush3.bf16.msra.mxu1 %v1764_v50 }
  0x78   :  { %1409 = vmatprep.subr.bf16.mxu0 %v1653_v0  ;;  %1433 = vmatprep.subr.bf16.mxu1 %v1653_v0 }
 0x12d   :  { %v1015_v59 = vpop.f32.mrb[0].mxu0  ;;  %v288_v60 = vpop.f32.mrb[0].mxu1 }
 0x12e   :  { %v149_v61 = vpop.f32.mrb[1].mxu0  ;;  %v1059_v62 = vpop.f32.mrb[1].mxu1  ;;  %v190_v11 = vadd.f32 %v1015_v59, %v1810_v58 }
 0x12f   :  { %v189_v63 = vadd.f32 %v1810_v58, %v149_v61 }
 0x131   :  { %v289_v2 = vadd.f32 %v288_v60, %v189_v63  ;;  %v1018_v4 = vpop.f32.mrb[2].mxu0 }
 0x132   :  { %v159_v5 = vpop.f32.mrb[3].mxu0  ;;  %v192_v23 = vadd.f32 %v1018_v4, %v1810_v58 }
 0x133   :  { %1538 = vtanh.f32 %v289_v2  ;;  %v191_v17 = vadd.f32 %v1810_v58, %v159_v5 }
 0x135   :  { %v1831_v6 = vpop.f32.mrb[4].mxu0 }
 0x136   :  { %v1833_v7 = vpop.f32.mrb[5].mxu0 }
 0x137   :  { %v193_v29 = vadd.f32 %v1810_v58, %v1833_v7 }
 0x139   :  { %v1835_v8 = vpop.f32.mrb[6].mxu0 }
 0x13a   :  { %v1837_v10 = vpop.f32.mrb[7].mxu0 }
 0x13d   :  { %v1539_v3 = vpop.eup %1538 }
 0x13e   :  { %1093 = vmatmul.mubr.f32.vlgmr.msra.gmra.mrb[8].mxu0 %v1539_v3 }
 0x13f   :  { %1411 = vmatpush3.bf16.msra.mxu0 %v1737_v9  ;;  %1162 = vmatprep.mubr.msk.f32.mxu0 %vm1654_vm0, %v1655_v1 }
 0x140   :  { %1412 = vmatprep.subr.bf16.mxu0 %v1653_v0 }
 0x143   :  { %1414 = vmatpush3.bf16.msra.mxu0 %v1740_v15 }
 0x144   :  { %1415 = vmatprep.subr.bf16.mxu0 %v1653_v0 }
 0x147   :  { %1417 = vmatpush3.bf16.msra.mxu0 %v1744_v21 }
 0x148   :  { %1418 = vmatprep.subr.bf16.mxu0 %v1653_v0 }
 0x14b   :  { %1420 = vmatpush3.bf16.msra.mxu0 %v1748_v28 }
 0x14c   :  { %1421 = vmatprep.subr.bf16.mxu0 %v1653_v0 }
 0x14f   :  { %1423 = vmatpush3.bf16.msra.mxu0 %v1752_v34 }
 0x150   :  { %1424 = vmatprep.subr.bf16.mxu0 %v1653_v0 }
 0x153   :  { %1426 = vmatpush3.bf16.msra.mxu0 %v1756_v40 }
 0x154   :  { %1427 = vmatprep.subr.bf16.mxu0 %v1653_v0 }
 0x157   :  { %1429 = vmatpush3.bf16.msra.mxu0 %v1760_v46 }
 0x158   :  { %1430 = vmatprep.subr.bf16.mxu0 %v1653_v0 }
 0x15b   :  { %1432 = vmatpush3.bf16.msra.mxu0 %v1764_v50 }
 0x15c   :  { %1457 = vmatprep.subr.bf16.mxu0 %v1653_v0 }
 0x211   :  { %v361_v12 = vpop.f32.mrb[8].mxu0 }
 0x212   :  { %v362_v13 = vadd.f32 %v361_v12, %v190_v11  ;;  %v1094_v14 = vpop.f32.mrb[9].mxu0 }
 0x214   :  { %1540 = vtanh.f32 %v362_v13 }
 0x21e   :  { %v1541_v16 = vpop.eup %1540 }
 0x21f   :  { %1128 = vmatmul.mubr.f32.vlgmr.msra.gmra.mrb[2].mxu1 %v1541_v16 }
 0x220   :  { %1435 = vmatpush3.bf16.msra.mxu1 %v1737_v9  ;;  %1197 = vmatprep.mubr.msk.f32.mxu1 %vm1654_vm0, %v1655_v1 }
 0x221   :  { %1436 = vmatprep.subr.bf16.mxu1 %v1653_v0 }
 0x224   :  { %1438 = vmatpush3.bf16.msra.mxu1 %v1740_v15 }
 0x225   :  { %1439 = vmatprep.subr.bf16.mxu1 %v1653_v0 }
 0x228   :  { %1441 = vmatpush3.bf16.msra.mxu1 %v1744_v21 }
 0x229   :  { %1442 = vmatprep.subr.bf16.mxu1 %v1653_v0 }
 0x22c   :  { %1444 = vmatpush3.bf16.msra.mxu1 %v1748_v28 }
 0x22d   :  { %1445 = vmatprep.subr.bf16.mxu1 %v1653_v0 }
 0x230   :  { %1447 = vmatpush3.bf16.msra.mxu1 %v1752_v34 }
 0x231   :  { %1448 = vmatprep.subr.bf16.mxu1 %v1653_v0 }
 0x234   :  { %1450 = vmatpush3.bf16.msra.mxu1 %v1756_v40 }
 0x235   :  { %1451 = vmatprep.subr.bf16.mxu1 %v1653_v0 }
 0x238   :  { %1453 = vmatpush3.bf16.msra.mxu1 %v1760_v46 }
 0x239   :  { %1454 = vmatprep.subr.bf16.mxu1 %v1653_v0 }
 0x23c   :  { %1456 = vmatpush3.bf16.msra.mxu1 %v1764_v50 }
 0x23d   :  { %1481 = vmatprep.subr.bf16.mxu1 %v1653_v0 }
 0x2f2   :  { %v434_v18 = vpop.f32.mrb[2].mxu1 }
 0x2f3   :  { %v435_v19 = vadd.f32 %v434_v18, %v191_v17  ;;  %v1129_v20 = vpop.f32.mrb[3].mxu1 }
 0x2f5   :  { %1542 = vtanh.f32 %v435_v19 }
 0x2ff   :  { %v1543_v22 = vpop.eup %1542 }
 0x300   :  { %1163 = vmatmul.mubr.f32.vlgmr.msra.gmra.mrb[10].mxu0 %v1543_v22 }
 0x301   :  { %1459 = vmatpush3.bf16.msra.mxu0 %v1737_v9  ;;  %1232 = vmatprep.mubr.msk.f32.mxu0 %vm1654_vm0, %v1655_v1 }
 0x302   :  { %1460 = vmatprep.subr.bf16.mxu0 %v1653_v0 }
 0x305   :  { %1462 = vmatpush3.bf16.msra.mxu0 %v1740_v15 }
 0x306   :  { %1463 = vmatprep.subr.bf16.mxu0 %v1653_v0 }
 0x309   :  { %1465 = vmatpush3.bf16.msra.mxu0 %v1744_v21 }
 0x30a   :  { %1466 = vmatprep.subr.bf16.mxu0 %v1653_v0 }
 0x30d   :  { %1468 = vmatpush3.bf16.msra.mxu0 %v1748_v28 }
 0x30e   :  { %1469 = vmatprep.subr.bf16.mxu0 %v1653_v0 }
 0x311   :  { %1471 = vmatpush3.bf16.msra.mxu0 %v1752_v34 }
 0x312   :  { %1472 = vmatprep.subr.bf16.mxu0 %v1653_v0 }
 0x315   :  { %1474 = vmatpush3.bf16.msra.mxu0 %v1756_v40 }
 0x316   :  { %1475 = vmatprep.subr.bf16.mxu0 %v1653_v0 }
 0x319   :  { %1477 = vmatpush3.bf16.msra.mxu0 %v1760_v46 }
 0x31a   :  { %1478 = vmatprep.subr.bf16.mxu0 %v1653_v0 }
 0x31d   :  { %1480 = vmatpush3.bf16.msra.mxu0 %v1764_v50 }
 0x31e   :  { %1505 = vmatprep.subr.bf16.mxu0 %v1653_v0 }
 0x3d3   :  { %v507_v24 = vpop.f32.mrb[10].mxu0 }
 0x3d4   :  { %v508_v25 = vadd.f32 %v507_v24, %v192_v23  ;;  %v1164_v26 = vpop.f32.mrb[11].mxu0 }
 0x3d6   :  { %1544 = vtanh.f32 %v508_v25 }
 0x3e0   :  { %v1545_v27 = vpop.eup %1544 }
 0x3e1   :  { %1198 = vmatmul.mubr.f32.vlgmr.msra.gmra.mrb[4].mxu1 %v1545_v27 }
 0x3e2   :  { %1483 = vmatpush3.bf16.msra.mxu1 %v1737_v9  ;;  %1267 = vmatprep.mubr.msk.f32.mxu1 %vm1654_vm0, %v1655_v1 }
 0x3e3   :  { %1484 = vmatprep.subr.bf16.mxu1 %v1653_v0 }
 0x3e6   :  { %1486 = vmatpush3.bf16.msra.mxu1 %v1740_v15 }
 0x3e7   :  { %1487 = vmatprep.subr.bf16.mxu1 %v1653_v0 }
 0x3ea   :  { %1489 = vmatpush3.bf16.msra.mxu1 %v1744_v21 }
 0x3eb   :  { %1490 = vmatprep.subr.bf16.mxu1 %v1653_v0 }
 0x3ee   :  { %1492 = vmatpush3.bf16.msra.mxu1 %v1748_v28 }
 0x3ef   :  { %1493 = vmatprep.subr.bf16.mxu1 %v1653_v0 }
 0x3f2   :  { %1495 = vmatpush3.bf16.msra.mxu1 %v1752_v34 }
 0x3f3   :  { %1496 = vmatprep.subr.bf16.mxu1 %v1653_v0 }
 0x3f6   :  { %1498 = vmatpush3.bf16.msra.mxu1 %v1756_v40 }
 0x3f7   :  { %1499 = vmatprep.subr.bf16.mxu1 %v1653_v0 }
 0x3fa   :  { %1501 = vmatpush3.bf16.msra.mxu1 %v1760_v46 }
 0x3fb   :  { %1502 = vmatprep.subr.bf16.mxu1 %v1653_v0 }
 0x3fe   :  { %1504 = vmatpush3.bf16.msra.mxu1 %v1764_v50 }
 0x4b4   :  { %v580_v30 = vpop.f32.mrb[4].mxu1 }
 0x4b5   :  { %v581_v31 = vadd.f32 %v580_v30, %v193_v29  ;;  %v1199_v32 = vpop.f32.mrb[5].mxu1 }
 0x4b7   :  { %1546 = vtanh.f32 %v581_v31 }
 0x4c1   :  { %v1547_v33 = vpop.eup %1546 }
 0x4c2   :  { %1233 = vmatmul.mubr.f32.vlgmr.msra.gmra.mrb[12].mxu0 %v1547_v33 }
 0x4c3   :  { %1507 = vmatpush3.bf16.msra.mxu0 %v1737_v9  ;;  %1302 = vmatprep.mubr.msk.f32.mxu0 %vm1654_vm0, %v1655_v1  ;;  %v194_v1 = vadd.f32 %v1831_v6, %v1810_v58 }
 0x4c4   :  { %1508 = vmatprep.subr.bf16.mxu0 %v1653_v0 }
 0x4c7   :  { %1510 = vmatpush3.bf16.msra.mxu0 %v1740_v15 }
 0x4c8   :  { %1511 = vmatprep.subr.bf16.mxu0 %v1653_v0 }
 0x4cb   :  { %1513 = vmatpush3.bf16.msra.mxu0 %v1744_v21 }
 0x4cc   :  { %1514 = vmatprep.subr.bf16.mxu0 %v1653_v0 }
 0x4cf   :  { %1516 = vmatpush3.bf16.msra.mxu0 %v1748_v28 }
 0x4d0   :  { %1517 = vmatprep.subr.bf16.mxu0 %v1653_v0 }
 0x4d3   :  { %1519 = vmatpush3.bf16.msra.mxu0 %v1752_v34  ;;  %v195_v34 = vadd.f32 %v1810_v58, %v1837_v10 }
 0x4d4   :  { %1520 = vmatprep.subr.bf16.mxu0 %v1653_v0 }
 0x4d7   :  { %1522 = vmatpush3.bf16.msra.mxu0 %v1756_v40 }
 0x4d8   :  { %1523 = vmatprep.subr.bf16.mxu0 %v1653_v0 }
 0x4db   :  { %1525 = vmatpush3.bf16.msra.mxu0 %v1760_v46 }
 0x4dc   :  { %1526 = vmatprep.subr.bf16.mxu0 %v1653_v0  ;;  %v196_v0 = vadd.f32 %v1835_v8, %v1810_v58 }
 0x4df   :  { %1528 = vmatpush3.bf16.msra.mxu0 %v1764_v50 }
 0x595   :  { %v653_v9 = vpop.f32.mrb[12].mxu0 }
 0x596   :  { %v654_v15 = vadd.f32 %v653_v9, %v194_v1  ;;  %v1234_v21 = vpop.f32.mrb[13].mxu0 }
 0x598   :  { %1548 = vtanh.f32 %v654_v15 }
 0x5a2   :  { %v1549_v28 = vpop.eup %1548 }
 0x5a3   :  { %1268 = vmatmul.mubr.f32.vlgmr.msra.gmra.mrb[6].mxu1 %v1549_v28 }
 0x676   :  { %v726_v35 = vpop.f32.mrb[6].mxu1 }
 0x677   :  { %v727_v36 = vadd.f32 %v726_v35, %v195_v34  ;;  %v1269_v37 = vpop.f32.mrb[7].mxu1 }
 0x679   :  { %1550 = vtanh.f32 %v727_v36 }
 0x683   :  { %v1551_v38 = vpop.eup %1550 }
 0x684   :  { %1303 = vmatmul.mubr.f32.vlgmr.msra.gmra.mrb[14].mxu0 %v1551_v38 }
 0x757   :  { %v799_v39 = vpop.f32.mrb[14].mxu0 }
 0x758   :  { %v800_v40 = vadd.f32 %v799_v39, %v196_v0  ;;  %v1304_v41 = vpop.f32.mrb[15].mxu0 }
 0x75a   :  { %1552 = vtanh.f32 %v800_v40 }
 0x764   :  { %v1553_v42 = vpop.eup %1552 }
 0x765   :  { %804 = vst [vmem:[#allocation9] sm:$0xff] %v1553_v42 }
 0x766   :  { %1631 = shalt.err (!%p1628_p0)
}
 0x767   :  { %s1632_s30 = scalar_lea.hbm %s1936_s4, 128 }
 0x768   :  { %p1633_p1 = scmp.ne.s32.totalorder %s1936_s4, %s1632_s30  ;;  %p1636_p2 = scmp.lt.u32.totalorder %s1632_s30, %s1936_s4 }
 0x76a   :  { %p1638_p3 = pnand %p1636_p2, %p1633_p1 }
 0x76c   :  { %1641 = shalt.err (!%p1638_p3)
}
 0x76d   :  { %814 = dma.vmem_to_hbm [thread:$0]  %s812_s26, 128, %s1936_s4, [#allocation5]  }
 0x76e   :  { %1646 = dma.done.wait [#allocation5], 128  }
 0x76f   :  { %1647 = vsyncadd [#allocation5], 4294967168 }
 0x770   :  { %818 = vsyncpa [#allocation4], 1 }
 0x771   :  { %819 = vsyncpa [#allocation7], 1 }
 0x772   :  { %820 = vsyncpa [#allocation5], 1 }

</bundles_post_ra>
